<compile_context>
chip_gen: v6e
topology: v6e:2x2x1
jax: 0.10.0
libtpu: 0.0.40
codegen_flags: <defaults>
</compile_context>

<pallas_src>
import functools

import jax
import jax.numpy as jnp
from jax.experimental import pallas as pl
from jax.experimental.pallas import tpu as pltpu

# (num_blocks, in_ch, bottleneck width D (=32 groups x d), out_ch, first-block stride)
STAGES = [
    (3,   64,  128,  256, 1),
    (4,  256,  256,  512, 2),
    (23, 512,  512, 1024, 2),
    (3, 1024, 1024, 2048, 2),
]

KS_GROUPED = 9 * 128  # K slab width per 128-wide output tile of the grouped conv


def _rup(n, m):
  return ((n + m - 1) // m) * m


def _m_tiling(M):
  """Pick (padded M, M tile). M tiled at 512 -> parallel grid axis, small VMEM."""
  if M >= 512:
    return _rup(M, 512), 512
  Mp = _rup(M, 8)
  return Mp, Mp


def _pick_tile(dim_padded, cands=(512, 256, 128)):
  """Biggest tile (<=512) dividing the padded dim; dims are 128-multiples."""
  for t in cands:
    if dim_padded % t == 0:
      return t
  return dim_padded


# ---------------------------------------------------------------------------
# Pallas kernels
# ---------------------------------------------------------------------------
@functools.lru_cache(maxsize=None)
def _make_matmul_kernel(use_relu: bool, use_res: bool, multi_k: bool):
  """O = act((X @ W) * scale + bias [+ residual]); bf16 operands, f32 acc."""

  def epilogue(acc, s_ref, b_ref, r_ref, o_ref):
    y = acc * s_ref[...] + b_ref[...]
    if use_res:
      y = y + r_ref[...].astype(jnp.float32)
    if use_relu:
      y = jnp.maximum(y, 0.0)
    o_ref[...] = y.astype(o_ref.dtype)

  if multi_k:
    def kernel(*refs):
      if use_res:
        x_ref, w_ref, s_ref, b_ref, r_ref, o_ref, acc_ref = refs
      else:
        x_ref, w_ref, s_ref, b_ref, o_ref, acc_ref = refs
        r_ref = None
      k = pl.program_id(2)

      @pl.when(k == 0)
      def _init():
        acc_ref[...] = jnp.zeros_like(acc_ref)

      acc_ref[...] += jnp.dot(x_ref[...], w_ref[...],
                              preferred_element_type=jnp.float32)

      @pl.when(k == pl.num_programs(2) - 1)
      def _finalize():
        epilogue(acc_ref[...], s_ref, b_ref, r_ref, o_ref)
  else:
    def kernel(*refs):
      if use_res:
        x_ref, w_ref, s_ref, b_ref, r_ref, o_ref = refs
      else:
        x_ref, w_ref, s_ref, b_ref, o_ref = refs
        r_ref = None
      acc = jnp.dot(x_ref[...], w_ref[...], preferred_element_type=jnp.float32)
      epilogue(acc, s_ref, b_ref, r_ref, o_ref)

  return kernel


def _grouped_matmul_kernel(x_ref, w_ref, s_ref, b_ref, o_ref):
  """Grouped 3x3 conv tile: only the non-zero 9*128-wide K slab is read."""
  acc = jnp.dot(x_ref[...], w_ref[0], preferred_element_type=jnp.float32)
  y = acc * s_ref[...] + b_ref[...]
  o_ref[...] = jnp.maximum(y, 0.0).astype(o_ref.dtype)


def _maxpool_kernel(x_ref, o_ref):
  # x_ref: (9, TM, Cp) shifted-window taps; reduce max over the 9 taps.
  o_ref[...] = jnp.max(x_ref[...], axis=0)


# ---------------------------------------------------------------------------
# Pallas wrappers
# ---------------------------------------------------------------------------
def matmul_bn_act(x2d, w, scale, bias, n_out, relu=True, residual=None):
  """x2d: (M, K); w: pre-padded bf16 (Kp, Np); fused BN / residual / ReLU."""
  M, K = x2d.shape
  Kp, Np = w.shape
  Mp, TM = _m_tiling(M)
  TN = _pick_tile(Np)
  multi_k = Kp > 512
  TK = _pick_tile(Kp) if multi_k else Kp

  xp = x2d.astype(jnp.bfloat16)
  if (Mp, Kp) != (M, K):
    xp = jnp.pad(xp, ((0, Mp - M), (0, Kp - K)))

  use_res = residual is not None
  args = [xp, w, scale, bias]
  if use_res:
    rp = residual.astype(jnp.bfloat16)
    if rp.shape != (Mp, Np):
      rp = jnp.pad(rp, ((0, Mp - rp.shape[0]), (0, Np - rp.shape[1])))
    args.append(rp)

  kernel = _make_matmul_kernel(bool(relu), use_res, multi_k)

  if multi_k:
    grid = (Mp // TM, Np // TN, Kp // TK)
    in_specs = [
        pl.BlockSpec((TM, TK), lambda i, j, k: (i, k)),
        pl.BlockSpec((TK, TN), lambda i, j, k: (k, j)),
        pl.BlockSpec((1, TN), lambda i, j, k: (0, j)),
        pl.BlockSpec((1, TN), lambda i, j, k: (0, j)),
    ]
    if use_res:
      in_specs.append(pl.BlockSpec((TM, TN), lambda i, j, k: (i, j)))
    out_specs = pl.BlockSpec((TM, TN), lambda i, j, k: (i, j))
    scratch = [pltpu.VMEM((TM, TN), jnp.float32)]
    dims = ("parallel", "parallel", "arbitrary")
  else:
    grid = (Mp // TM, Np // TN)
    in_specs = [
        pl.BlockSpec((TM, TK), lambda i, j: (i, 0)),
        pl.BlockSpec((TK, TN), lambda i, j: (0, j)),
        pl.BlockSpec((1, TN), lambda i, j: (0, j)),
        pl.BlockSpec((1, TN), lambda i, j: (0, j)),
    ]
    if use_res:
      in_specs.append(pl.BlockSpec((TM, TN), lambda i, j: (i, j)))
    out_specs = pl.BlockSpec((TM, TN), lambda i, j: (i, j))
    scratch = []
    dims = ("parallel", "parallel")

  out = pl.pallas_call(
      kernel,
      out_shape=jax.ShapeDtypeStruct((Mp, Np), jnp.bfloat16),
      grid_spec=pltpu.PrefetchScalarGridSpec(
          num_scalar_prefetch=0,
          grid=grid,
          in_specs=in_specs,
          out_specs=out_specs,
          scratch_shapes=scratch,
      ),
      compiler_params=pltpu.CompilerParams(dimension_semantics=dims),
  )(*args)
  if (M, n_out) != (Mp, Np):
    out = out[:M, :n_out]
  return out


def conv_bn_act(x, w, scale, bias, *, kh, kw, cout, stride, pad,
                relu=True, residual=None):
  """Dense NHWC conv (im2col, (dy,dx,cin) K order) + folded BN + res/ReLU."""
  Nb, H, W, C = x.shape
  if pad > 0:
    x = jnp.pad(x, ((0, 0), (pad, pad), (pad, pad), (0, 0)))
  Hp, Wp = x.shape[1], x.shape[2]
  Ho = (Hp - kh) // stride + 1
  Wo = (Wp - kw) // stride + 1

  if kh == 1 and kw == 1:
    x2d = x[:, ::stride, ::stride, :].reshape(Nb * Ho * Wo, C)
  else:
    slices = []
    for dy in range(kh):
      for dx in range(kw):
        slices.append(x[:, dy:dy + stride * (Ho - 1) + 1:stride,
                        dx:dx + stride * (Wo - 1) + 1:stride, :])
    patches = jnp.concatenate(slices, axis=-1)        # (dy, dx, cin) K order
    x2d = patches.reshape(Nb * Ho * Wo, kh * kw * C)

  res2d = None if residual is None else residual.reshape(Nb * Ho * Wo, cout)
  out2d = matmul_bn_act(x2d, w, scale, bias, cout, relu=relu, residual=res2d)
  return out2d.reshape(Nb, Ho, Wo, cout)


def grouped_conv3x3_bn_relu(x, w_tiles, scale, bias, *, stride):
  """Grouped 3x3 conv (32 groups) + BN + ReLU.

  Patches are channel-major (K index = c*9 + tap) so output tile j only needs
  the contiguous K slab of its own 128 input channels; the weight is stored as
  (D/128, 1152, 128) per-tile blocks -> zero K tiles are never touched.
  """
  Nb, H, W, D = x.shape
  xpd = jnp.pad(x, ((0, 0), (1, 1), (1, 1), (0, 0)))
  Hp, Wp = H + 2, W + 2
  Ho = (Hp - 3) // stride + 1
  Wo = (Wp - 3) // stride + 1

  slices = []
  for dy in range(3):
    for dx in range(3):
      slices.append(xpd[:, dy:dy + stride * (Ho - 1) + 1:stride,
                        dx:dx + stride * (Wo - 1) + 1:stride, :])
  patches = jnp.stack(slices, axis=-1)                 # (Nb, Ho, Wo, D, 9)
  x2d = patches.reshape(Nb * Ho * Wo, D * 9).astype(jnp.bfloat16)

  M = Nb * Ho * Wo
  Mp, TM = _m_tiling(M)
  if Mp != M:
    x2d = jnp.pad(x2d, ((0, Mp - M), (0, 0)))
  ntiles = D // 128

  out = pl.pallas_call(
      _grouped_matmul_kernel,
      out_shape=jax.ShapeDtypeStruct((Mp, D), jnp.bfloat16),
      grid_spec=pltpu.PrefetchScalarGridSpec(
          num_scalar_prefetch=0,
          grid=(Mp // TM, ntiles),
          in_specs=[
              pl.BlockSpec((TM, KS_GROUPED), lambda i, j: (i, j)),
              pl.BlockSpec((1, KS_GROUPED, 128), lambda i, j: (j, 0, 0)),
              pl.BlockSpec((1, 128), lambda i, j: (0, j)),
              pl.BlockSpec((1, 128), lambda i, j: (0, j)),
          ],
          out_specs=pl.BlockSpec((TM, 128), lambda i, j: (i, j)),
      ),
      compiler_params=pltpu.CompilerParams(
          dimension_semantics=("parallel", "parallel")),
  )(x2d, w_tiles, scale, bias)
  if Mp != M:
    out = out[:M]
  return out.reshape(Nb, Ho, Wo, D)


def maxpool2d_3x3_s2_p1(x):
  """MaxPool2d(kernel=3, stride=2, padding=1), NHWC, -inf padding, M-tiled."""
  Nb, H, W, C = x.shape
  xp = jnp.pad(x, ((0, 0), (1, 1), (1, 1), (0, 0)), constant_values=-jnp.inf)
  Ho = (H + 2 - 3) // 2 + 1
  Wo = (W + 2 - 3) // 2 + 1
  slices = []
  for dy in range(3):
    for dx in range(3):
      slices.append(xp[:, dy:dy + 2 * (Ho - 1) + 1:2,
                       dx:dx + 2 * (Wo - 1) + 1:2, :])
  stacked = jnp.stack(slices, axis=0).reshape(9, Nb * Ho * Wo, C)

  M = Nb * Ho * Wo
  Mp, TM = _m_tiling(M)
  Cp = _rup(C, 128)
  if (Mp, Cp) != (M, C):
    stacked = jnp.pad(stacked, ((0, 0), (0, Mp - M), (0, Cp - C)),
                      constant_values=-jnp.inf)
  out = pl.pallas_call(
      _maxpool_kernel,
      out_shape=jax.ShapeDtypeStruct((Mp, Cp), x.dtype),
      grid=(Mp // TM,),
      in_specs=[pl.BlockSpec((9, TM, Cp), lambda i: (0, i, 0))],
      out_specs=pl.BlockSpec((TM, Cp), lambda i: (i, 0)),
      compiler_params=pltpu.CompilerParams(
          dimension_semantics=("parallel",)),
  )(stacked)
  return out[:M, :C].reshape(Nb, Ho, Wo, C)


# ---------------------------------------------------------------------------
# Parameter construction (deterministic synthetic; pre-padded, pre-cast bf16)
# ---------------------------------------------------------------------------
def init_params(key):
  keys = iter(jax.random.split(key, 4096))
  nk = lambda: next(keys)

  def conv_w(cout, cin, kh, kw):
    # stored in matmul layout (K, N) = (kh*kw*cin, cout), (dy, dx, cin) K
    # order, pre-padded to multiples of 128 and pre-cast to bf16.
    std = (2.0 / (cin * kh * kw)) ** 0.5
    w = jax.random.normal(nk(), (kh, kw, cin, cout), jnp.float32) * std
    K, N = kh * kw * cin, cout
    Kp, Np = _rup(K, 128), _rup(N, 128)
    w2d = jnp.pad(w.reshape(K, N), ((0, Kp - K), (0, Np - N)))
    return w2d.astype(jnp.bfloat16)

  def grouped_conv_w(D, groups=32):
    # per-128-wide-output-tile dense blocks: (D//128, 9*128, 128), row order
    # (c_local*9 + tap) matching the channel-major patch layout, col order is
    # the natural (group-major) output channel order -> no cross-layer permute.
    d = D // groups
    gpt = 128 // d                    # groups packed per 128-wide tile
    ntiles = D // 128
    std = (2.0 / (d * 9)) ** 0.5
    blocks = jax.random.normal(nk(), (groups, 3, 3, d, d), jnp.float32) * std
    bt = blocks.reshape(ntiles, gpt, 3, 3, d, d)     # (t, g, dy, dx, ci, co)
    eye = jnp.eye(gpt, dtype=jnp.float32)
    w = jnp.einsum('tgabij,gh->tgiabhj', bt, eye)    # block-diag within tile
    w = w.reshape(ntiles, 128 * 9, 128)
    return w.astype(jnp.bfloat16)

  def bn(c):
    r = jax.random.normal(nk(), (3, c), jnp.float32)
    gamma = 1.0 + 0.1 * r[0]
    beta = 0.1 * r[1]
    mean = 0.05 * r[2]
    var = jnp.ones((c,), jnp.float32)
    eps = 1e-5
    scale = gamma * jax.lax.rsqrt(var + eps)
    bias = beta - mean * scale
    Np = _rup(c, 128)
    scale = jnp.pad(scale, (0, Np - c)).reshape(1, Np)
    bias = jnp.pad(bias, (0, Np - c)).reshape(1, Np)
    return scale, bias

  params = {'w0': conv_w(64, 3, 7, 7), 'bn0': bn(64)}
  for si, (nblocks, cin, D, cout, stride) in enumerate(STAGES, start=1):
    blocks = []
    for b in range(nblocks):
      bcin = cin if b == 0 else cout
      blk = {
          'w1': conv_w(D, bcin, 1, 1), 'bn1': bn(D),
          'w2': grouped_conv_w(D), 'bn2': bn(D),
          'w3': conv_w(cout, D, 1, 1), 'bn3': bn(cout),
      }
      if b == 0:  # projection shortcut on the first block of every stage
        blk['wp'] = conv_w(cout, bcin, 1, 1)
        blk['bnp'] = bn(cout)
      blocks.append(blk)
    params[f'stage{si}'] = blocks
  return params


# ---------------------------------------------------------------------------
# Forward pass (ResNeXt101.forward -> [layer0, layer1, layer2, layer3, layer4])
# ---------------------------------------------------------------------------
def block_forward(x, blk, D, cout, stride):
  if 'wp' in blk:
    sc = conv_bn_act(x, blk['wp'], *blk['bnp'], kh=1, kw=1, cout=cout,
                     stride=stride, pad=0, relu=False)
  else:
    sc = x
  y = conv_bn_act(x, blk['w1'], *blk['bn1'], kh=1, kw=1, cout=D,
                  stride=1, pad=0, relu=True)
  y = grouped_conv3x3_bn_relu(y, blk['w2'], *blk['bn2'], stride=stride)
  # last 1x1 conv: BN + residual add + ReLU fused into the Pallas epilogue
  y = conv_bn_act(y, blk['w3'], *blk['bn3'], kh=1, kw=1, cout=cout,
                  stride=1, pad=0, relu=True, residual=sc)
  return y


def resnext101_forward(x_nchw, params):
  x = jnp.transpose(x_nchw, (0, 2, 3, 1)).astype(jnp.bfloat16)  # NCHW -> NHWC
  # layer0: 7x7/2 conv + BN + ReLU
  l0 = conv_bn_act(x, params['w0'], *params['bn0'], kh=7, kw=7, cout=64,
                   stride=2, pad=3, relu=True)
  # layer1: maxpool 3x3/2 + stage1; layer2..4: stages 2..4
  y = maxpool2d_3x3_s2_p1(l0)
  stage_outs = []
  for si, (nblocks, cin, D, cout, stage_stride) in enumerate(STAGES, start=1):
    for b, blk in enumerate(params[f'stage{si}']):
      stride = stage_stride if b == 0 else 1
      y = block_forward(y, blk, D, cout, stride)
    stage_outs.append(y)
  l1, l2, l3, l4 = stage_outs
  # return NCHW f32 like the PyTorch module
  return [jnp.transpose(t, (0, 3, 1, 2)).astype(jnp.float32)
          for t in (l0, l1, l2, l3, l4)]


if __name__ == "__main__":
  key = jax.random.PRNGKey(0)
  pkey, xkey = jax.random.split(key)
  params = init_params(pkey)
  x = jax.random.normal(xkey, (2, 3, 64, 64), jnp.float32)

  outs = resnext101_forward(x, params)
  for o in outs:
    jax.block_until_ready(o)

  expected = [(2, 64, 32, 32), (2, 256, 16, 16), (2, 512, 8, 8),
              (2, 1024, 4, 4), (2, 2048, 2, 2)]
  assert [tuple(o.shape) for o in outs] == expected, \
      [tuple(o.shape) for o in outs]
  print("KERNEL_OK")
</pallas_src>

<mosaic_0001>
module attributes {stable_mosaic.version = 11 : i64} {
  func.func @kernel(%arg0: i32, %arg1: i32, %arg2: memref<512x256xbf16, #tpu.memory_space<vmem>>, %arg3: memref<256x128xbf16, #tpu.memory_space<vmem>>, %arg4: memref<1x128xf32, #tpu.memory_space<vmem>>, %arg5: memref<1x128xf32, #tpu.memory_space<vmem>>, %arg6: memref<512x128xbf16, #tpu.memory_space<vmem>>) attributes {dimension_semantics = [#tpu.dimension_semantics<parallel>, #tpu.dimension_semantics<parallel>], iteration_bounds = array<i64: 4, 1>, scalar_prefetch = 0 : i64, scratch_operands = 0 : i64, tpu.core_type = #tpu.core_type<tc>, window_params = [{transform_indices = @transform_0, window_bounds = array<i64: 512, 256>}, {transform_indices = @transform_1, window_bounds = array<i64: 256, 128>}, {transform_indices = @transform_2, window_bounds = array<i64: 1, 128>}, {transform_indices = @transform_3, window_bounds = array<i64: 1, 128>}, {transform_indices = @transform_4, window_bounds = array<i64: 512, 128>}]} {
    %c0 = arith.constant 0 : index
    %c0_0 = arith.constant 0 : index
    %0 = vector.load %arg2[%c0, %c0_0] : memref<512x256xbf16, #tpu.memory_space<vmem>>, vector<512x256xbf16>
    %c0_1 = arith.constant 0 : index
    %c0_2 = arith.constant 0 : index
    %1 = vector.load %arg3[%c0_1, %c0_2] : memref<256x128xbf16, #tpu.memory_space<vmem>>, vector<256x128xbf16>
    %cst = arith.constant dense<0.000000e+00> : vector<512x128xf32>
    %2 = tpu.matmul %0, %1, %cst {dimension_numbers = #tpu.dot_dimension_numbers<[1], [0], [0], [1], [0, 0, 1, 1], [], []>} : vector<512x256xbf16>, vector<256x128xbf16>, vector<512x128xf32> -> vector<512x128xf32>
    %c0_3 = arith.constant 0 : index
    %c0_4 = arith.constant 0 : index
    %3 = vector.load %arg4[%c0_3, %c0_4] : memref<1x128xf32, #tpu.memory_space<vmem>>, vector<1x128xf32>
    %4 = vector.broadcast %3 : vector<1x128xf32> to vector<512x128xf32>
    %5 = arith.mulf %2, %4 : vector<512x128xf32>
    %c0_5 = arith.constant 0 : index
    %c0_6 = arith.constant 0 : index
    %6 = vector.load %arg5[%c0_5, %c0_6] : memref<1x128xf32, #tpu.memory_space<vmem>>, vector<1x128xf32>
    %7 = vector.broadcast %6 : vector<1x128xf32> to vector<512x128xf32>
    %8 = arith.addf %5, %7 : vector<512x128xf32>
    %cst_7 = arith.constant 0.000000e+00 : f32
    %9 = vector.broadcast %cst_7 : f32 to vector<512x128xf32>
    %10 = arith.maximumf %8, %9 : vector<512x128xf32>
    %11 = arith.truncf %10 : vector<512x128xf32> to vector<512x128xbf16>
    %c0_8 = arith.constant 0 : index
    %c0_9 = arith.constant 0 : index
    %12 = vector.load %arg6[%c0_8, %c0_9] : memref<512x128xbf16, #tpu.memory_space<vmem>>, vector<512x128xbf16>
    tpu.vector_store %arg6[%c0_8, %c0_9], %11 {strides = array<i32>} : memref<512x128xbf16, #tpu.memory_space<vmem>>, vector<512x128xbf16>,
    return
  }
  func.func @transform_0(%arg0: i32, %arg1: i32) -> (i32, i32) {
    %c0_i32 = arith.constant 0 : i32
    %c0_i32_0 = arith.constant 0 : i32
    return %arg0, %c0_i32 : i32, i32
  }
  func.func @transform_1(%arg0: i32, %arg1: i32) -> (i32, i32) {
    %c0_i32 = arith.constant 0 : i32
    %c0_i32_0 = arith.constant 0 : i32
    return %c0_i32, %arg1 : i32, i32
  }
  func.func @transform_2(%arg0: i32, %arg1: i32) -> (i32, i32) {
    %c0_i32 = arith.constant 0 : i32
    %c0_i32_0 = arith.constant 0 : i32
    return %c0_i32, %arg1 : i32, i32
  }
  func.func @transform_3(%arg0: i32, %arg1: i32) -> (i32, i32) {
    %c0_i32 = arith.constant 0 : i32
    %c0_i32_0 = arith.constant 0 : i32
    return %c0_i32, %arg1 : i32, i32
  }
  func.func @transform_4(%arg0: i32, %arg1: i32) -> (i32, i32) {
    %c0_i32 = arith.constant 0 : i32
    return %arg0, %arg1 : i32, i32
  }
}

</mosaic_0001>

<bundles_post_ra>
// kernel: tpu_custom_call.1
= control target key start
LH: loop header
LB: loop body
LE: loop exit
PB: predicated region body
PF: predicated region fallthrough
CT: control target
= control target key end

     0   :  { %s3019_s0 = inlined_call_operand.hbm [shape: bf16[2048,256], index: 0, kind: input, shape index: {}]   ;;  %s3020_s1 = inlined_call_operand.hbm [shape: bf16[256,128], index: 1, kind: input, shape index: {}]   ;;  %s3021_s2 = inlined_call_operand.vmem [shape: f32[1,128], index: 2, kind: input, shape index: {}]   ;;  %s3022_s3 = inlined_call_operand.vmem [shape: f32[1,128], index: 3, kind: input, shape index: {}]   ;;  %s3023_s4 = inlined_call_operand.hbm [shape: bf16[2048,128], index: 4, kind: output, shape index: {}]  }
   0x1   :  { %3025 = sst [smem:[#allocation11_spill]] %s3020_s1 }
   0x2   :  { %9 = vsyncpa [#allocation3], 0 }
   0x3   :  { %11 = vsyncpa [#allocation3 + $0x1], 0 }
   0x4   :  { %12 = vsyncpa [#allocation6], 0 }
   0x5   :  { %13 = vsyncpa [#allocation4], 0 }
   0x6   :  { %15 = vsyncpa [#allocation4 + $0x1], 0  ;;  %s2568_s15 = smov 0   ;;  %s2570_s16 = smov 0  }
   0x7   :  { %s2572_s17 = smov 0   ;;  %s2574_s18 = smov 0  }
   0x8   :  { %s2576_s19 = smov 0   ;;  %s2578_s20 = smov 0  }
   0x9 LB: > { %s1745_s21 = sadd.s32 4294967295, %s2531_s20   ;;  %s1746_s22 = sadd.s32 4294967294, %s2531_s20   ;;  %s2531_s20 = sphi %s2578_s20, %s21_s20   ;;  %s2527_s19 = sphi %s2576_s19, %s3042_s19   ;;  %s2523_s18 = sphi %s2574_s18, %s3041_s18   ;;  %s2519_s17 = sphi %s2572_s17, %s3040_s17   ;;  %s2515_s16 = sphi %s2570_s16, %s3039_s16   ;;  %s2511_s15 = sphi %s2568_s15, %s3038_s15  }
   0xa   : > { %p53_p0 = scmp.ne.s32.totalorder %s2515_s16, %s2511_s15  ;;  %p2602_p1 = scmp.eq.s32.totalorder %s1745_s21, 0 }
   0xb   : > { %p2606_p2 = scmp.eq.s32.totalorder %s1745_s21, 3  ;;  %p163_p3 = scmp.eq.s32.totalorder %s1746_s22, 3 }
   0xc   : > { %p2612_p4 = por %p2602_p1, %p53_p0  ;;  %p1747_p5 = scmp.ge.s32.totalorder %s2531_s20, 1 }
   0xd   : > { %p2617_p6 = por %p163_p3, %p53_p0  ;;  %p170_p7 = scmp.lt.s32.totalorder %s2531_s20, 5 }
   0xe   : > { %s2533_s28 = smov [#allocation5]   ;;  %s33_s5 = sadd.s32 1, %s2527_s19 }
   0xf   : > { %s3029_s26 = scalar_select %p2617_p6, 1, 0 }
  0x10   : > { %p2622_p8 = pnand %p1747_p5, %p170_p7  ;;  %s184_s29 = sshll.u32 %s2533_s28, 4  ;;  %s185_s29 = int_to_ptr.vmem [resolvable:$true] %s184_s29 }
  0x11   : > { %s2404_s6 = scalar_lea.vmem %s185_s29, 2048  ;;  %p2412_p3 = scmp.lt.s32.totalorder %s185_s29, %s185_s29 }
  0x12   : > { %p2209_p9 = pneg %p2622_p8  ;;  %p2405_p12 = scmp.ne.s32.totalorder %s185_s29, %s2404_s6 }
  0x13   : > { %p2413_p5 = scmp.lt.s32.totalorder %s2404_s6, %s2404_s6 }
  0x14   : > { %p2630_p10 = pnand %p2209_p9, %p2602_p1 }
  0x15   : > { %p2414_p7 = por %p2413_p5, %p2412_p3 }
  0x16   : > { %p2395_p11 = pneg %p2630_p10 }
  0x18   : > { %p2407_p13 = pnand %p2405_p12, %p2395_p11 }
  0x1a   : > { %p2408_p0 = pneg %p2407_p13 }
  0x1c   : > { %p2415_p6 = pnand %p2414_p7, %p2408_p0 }
  0x1e   : > { %2418 = shalt.err (!%p2415_p6)
}
  0x1f   : > { %s2534_s7 = smov 64   ;;  %s2535_s8 = smov 4  }
  0x20   : > { %s3032_s1 = sld [smem:[#allocation11_spill]]  ;;  %p35_p9 = scmp.ge.s32.totalorder %s33_s5, 4 }
  0x21   : > { %s40_s11 = sadd.s32 1, %s2519_s17  ;;  %p47_p6 = scmp.ne.s32.totalorder %s2519_s17, %s2515_s16 }
  0x22   : > { %p48_p11 = scmp.eq.s32.totalorder %s2531_s20, 0  ;;  %s3044_s5 = smov (%p35_p9, %s33_s5), 0 }
  0x23   : > { %p2654_p13 = por %p2606_p2, %p47_p6  ;;  %s37_s14 = ssub.s32 %s2527_s19, %s3044_s5 }
  0x24   : > { %p2648_p12 = por %p48_p11, %p47_p6  ;;  %p2222_p0 = scmp.lt.s32.totalorder %s2531_s20, 4 }
  0x25   : > { %s3034_s13 = scalar_select %p2654_p13, 1, 0 }
  0x26   : > { %2212 = dma.hbm_to_vmem [thread:$0]  (!%p2630_p10), %s3032_s1, 2048, %s185_s29, [#allocation6], %s2534_s7, %s2534_s7, %s2535_s8  }
  0x27   : > { %p38_p10 = scmp.eq.s32.totalorder %s37_s14, 0  ;;  %s210_s21 = sand.u32 1, %s2519_s17  }
  0x28   : > { %s1752_s22 = sshll.u32 %s210_s21, 9  ;;  %s1912_s29 = sshll.u32 %s2527_s19, 13 }
  0x29   : > { %s2663_s28 = scalar_select %p38_p10, %s2519_s17, %s40_s11  }
  0x2a   : > { %s221_s7 = scalar_lea.hbm %s3019_s0, %s1912_s29  ;;  %s214_s8 = scalar_lea.vmem [#allocation2], %s1752_s22 }
  0x2b   : > { %s222_s9 = sshll.u32 %s214_s8, 4  ;;  %p2671_p2 = pnand %p2222_p0, %p2648_p12  ;;  %s223_s9 = int_to_ptr.vmem [resolvable:$true] %s222_s9 }
  0x2c   : > { %s211_s10 = scalar_lea.sflag [#allocation3], %s210_s21  ;;  %s2432_s14 = scalar_lea.vmem %s223_s9, 8192 }
  0x2d   : > { %p2421_p3 = pneg %p2671_p2  ;;  %p2433_p5 = scmp.ne.s32.totalorder %s223_s9, %s2432_s14 }
  0x2e   : > { %s2536_s11 = smov [#allocation2]  }
  0x2f   : > { %p2435_p7 = pnand %p2433_p5, %p2421_p3  ;;  %s2437_s1 = sshll.u32 %s2536_s11, 4  ;;  %s2438_s1 = int_to_ptr.vmem [resolvable:$false] %s2437_s1 }
  0x30   : > { %s2439_s29 = scalar_lea.vmem %s2438_s1, 16384  ;;  %p2440_p6 = scmp.lt.s32.totalorder %s223_s9, %s2438_s1 }
  0x31   : > { %p2436_p9 = pneg %p2435_p7  ;;  %p2441_p11 = scmp.lt.s32.totalorder %s2439_s29, %s2432_s14 }
  0x33   : > { %p2442_p10 = por %p2441_p11, %p2440_p6 }
  0x35   : > { %p2443_p13 = pnand %p2442_p10, %p2436_p9 }
  0x37   : > { %2446 = shalt.err (!%p2443_p13)
}
  0x38   : > { %s2537_s12 = smov 128   ;;  %s2538_s22 = smov 8  }
  0x39   : > { %2216 = dma.hbm_to_vmem [thread:$0]  (!%p2671_p2), %s221_s7, 8192, %s223_s9, %s211_s10, %s2537_s12, %s2537_s12, %s2538_s22  }
  0x3a   : > { %234 = sbr.rel (%p2622_p8) target bundleno = 470 (0x1d6), region = 36  ;;  %s2682_s21 = sand.u32 (!%p2622_p8), 1, %s2515_s16  }
  0x3b   : > { %s1757_s30 = sshll.u32 (!%p2622_p8), %s2682_s21, 9  ;;  %s237_s1 = scalar_lea.sflag (!%p2622_p8), [#allocation3], %s2682_s21 }
  0x3c   : > { %s2686_s6 = scalar_lea.vmem (!%p2622_p8), [#allocation2], %s1757_s30 }
  0x3f   : > { %2498 = dma.done.wait (%p2612_p4), %s237_s1, 8192  }
  0x40   : > { %2500 = vsyncadd (%p2612_p4), %s237_s1, 4294959104 }
  0x41   : > { %2502 = dma.done.wait (%p2602_p1), [#allocation6], 2048  }
  0x42   : > { %2504 = vsyncadd (%p2602_p1), [#allocation6], 4294965248  ;;  %v2539_v0 = vmov 0   ;;  %v2281_v1 = vld [vmem:[#allocation5 + $0x38] sm:$0xff]   ;;  %v2282_v2 = vld [vmem:[#allocation5 + $0x30] sm:$0xff]   ;;  %s1759_s8 = sshll.u32 %s2682_s21, 8 }
  0x43   : > { %796 = vmatprep.subr.bf16.mxu0 %v2539_v0  ;;  %2169 = vmatprep.subr.bf16.mxu1 %v2539_v0  ;;  %v2283_v3 = vld [vmem:[#allocation5 + $0x28] sm:$0xff]   ;;  %v2284_v4 = vld [vmem:[#allocation5 + $0x20] sm:$0xff]   ;;  %v2285_v5 = vld [vmem:[#allocation5 + $0x18] sm:$0xff]   ;;  %s2815_s9 = scalar_lea.vmem [#allocation7], %s1759_s8  ;;  %s1977_s24 = sshll.u32 %s2523_s18, 12 }
  0x44   : > { %797 = vmatpush1.bf16.msra.mxu0 %v2281_v1  ;;  %2185 = vmatpush1.bf16.msra.mxu1 %v2281_v1  ;;  %v2299_v6 = vld [vmem:[%s2686_s6 + $0x4] ss:$8 sps:$4 sm:$0xff]   ;;  %v2286_v7 = vld [vmem:[#allocation5 + $0x10] sm:$0xff]   ;;  %v2289_v11 = vld [vmem:[#allocation5 + $0x78] sm:$0xff]   ;;  %s1626_s10 = sshll.u32 %s2815_s9, 4  ;;  %s2968_s29 = scalar_lea.hbm %s3023_s4, %s1977_s24  ;;  %s2970_s10 = int_to_ptr.vmem [resolvable:$true] %s1626_s10 }
  0x45   : > { %798 = vmatprep.subr.bf16.mxu0 %v2539_v0  ;;  %2170 = vmatprep.subr.bf16.mxu1 %v2539_v0  ;;  %v2302_v8 = vld [vmem:[%s2686_s6 + $0x104] ss:$8 sps:$4 sm:$0xff]   ;;  %v2290_v12 = vld [vmem:[#allocation5 + $0x70] sm:$0xff]   ;;  %v2293_v15 = vld [vmem:[#allocation5 + $0x58] sm:$0xff]   ;;  %s1612_s18 = scalar_lea.sflag [#allocation4], %s2682_s21  ;;  %s2447_s12 = scalar_lea.vmem %s2970_s10, 4096 }
  0x46   : > { %828 = vmatprep.mubr.bf16.mxu0 %v2299_v6  ;;  %956 = vmatprep.mubr.bf16.mxu1 %v2302_v8  ;;  %v2287_v9 = vld [vmem:[#allocation5 + $0x8] sm:$0xff]   ;;  %v2288_v10 = vld [vmem:[#allocation5] sm:$0xff]   ;;  %v2294_v16 = vld [vmem:[#allocation5 + $0x50] sm:$0xff]   ;;  %p2448_p1 = scmp.ne.s32.totalorder %s2970_s10, %s2447_s12  ;;  %p3036_p4 = scmp.ne.s32.totalorder %s3034_s13, 0 }
  0x47   : > { %v2291_v13 = vld [vmem:[#allocation5 + $0x68] sm:$0xff]   ;;  %v2292_v14 = vld [vmem:[#allocation5 + $0x60] sm:$0xff]   ;;  %v2303_v21 = vld [vmem:[%s2686_s6 + $0x14] ss:$8 sps:$4 sm:$0xff]   ;;  %s2540_s22 = smov [#allocation7]  }
  0x48   : > { %799 = vmatpush1.bf16.msra.mxu0 %v2282_v2  ;;  %2186 = vmatpush1.bf16.msra.mxu1 %v2282_v2  ;;  %v2295_v17 = vld [vmem:[#allocation5 + $0x48] sm:$0xff]   ;;  %v2296_v18 = vld [vmem:[#allocation5 + $0x40] sm:$0xff]   ;;  %v2305_v22 = vld [vmem:[%s2686_s6 + $0x114] ss:$8 sps:$4 sm:$0xff]   ;;  %p2449_p8 = pnand %p2448_p1, %p3036_p4  ;;  %s2451_s30 = sshll.u32 %s2540_s22, 4  ;;  %s2452_s30 = int_to_ptr.vmem [resolvable:$false] %s2451_s30 }
  0x49   : > { %800 = vmatprep.subr.bf16.mxu0 %v2539_v0  ;;  %2171 = vmatprep.subr.bf16.mxu1 %v2539_v0  ;;  %v2297_v19 = vld [vmem:[%s2686_s6] ss:$8 sps:$4 sm:$0xff]   ;;  %v2307_v23 = vld [vmem:[%s2686_s6 + $0x10] ss:$8 sps:$4 sm:$0xff]   ;;  %v2309_v25 = vld [vmem:[%s2686_s6 + $0x24] ss:$8 sps:$4 sm:$0xff]   ;;  %p2454_p13 = scmp.lt.s32.totalorder %s2970_s10, %s2452_s30 }
  0x4a   : > { %v2300_v20 = vld [vmem:[%s2686_s6 + $0x100] ss:$8 sps:$4 sm:$0xff]   ;;  %v2308_v24 = vld [vmem:[%s2686_s6 + $0x110] ss:$8 sps:$4 sm:$0xff]   ;;  %v2311_v26 = vld [vmem:[%s2686_s6 + $0x124] ss:$8 sps:$4 sm:$0xff]   ;;  %p2450_p12 = pneg %p2449_p8 }
  0x4b   : > { %v2313_v27 = vld [vmem:[%s2686_s6 + $0x20] ss:$8 sps:$4 sm:$0xff]   ;;  %v2315_v29 = vld [vmem:[%s2686_s6 + $0x34] ss:$8 sps:$4 sm:$0xff]   ;;  %v2319_v31 = vld [vmem:[%s2686_s6 + $0x30] ss:$8 sps:$4 sm:$0xff]  }
  0x4c   : > { %801 = vmatpush1.bf16.msra.mxu0 %v2283_v3  ;;  %2187 = vmatpush1.bf16.msra.mxu1 %v2283_v3  ;;  %v2314_v28 = vld [vmem:[%s2686_s6 + $0x120] ss:$8 sps:$4 sm:$0xff]   ;;  %v2317_v30 = vld [vmem:[%s2686_s6 + $0x134] ss:$8 sps:$4 sm:$0xff]   ;;  %v2320_v32 = vld [vmem:[%s2686_s6 + $0x130] ss:$8 sps:$4 sm:$0xff]  }
  0x4d   : > { %802 = vmatprep.subr.bf16.mxu0 %v2539_v0  ;;  %2172 = vmatprep.subr.bf16.mxu1 %v2539_v0  ;;  %v2321_v33 = vld [vmem:[%s2686_s6 + $0x44] ss:$8 sps:$4 sm:$0xff]   ;;  %v2325_v35 = vld [vmem:[%s2686_s6 + $0x40] ss:$8 sps:$4 sm:$0xff]   ;;  %v2327_v37 = vld [vmem:[%s2686_s6 + $0x54] ss:$8 sps:$4 sm:$0xff]  }
  0x4e   : > { %v2323_v34 = vld [vmem:[%s2686_s6 + $0x144] ss:$8 sps:$4 sm:$0xff]   ;;  %v2326_v36 = vld [vmem:[%s2686_s6 + $0x140] ss:$8 sps:$4 sm:$0xff]   ;;  %v2329_v38 = vld [vmem:[%s2686_s6 + $0x154] ss:$8 sps:$4 sm:$0xff]  }
  0x4f   : > { %v2331_v39 = vld [vmem:[%s2686_s6 + $0x50] ss:$8 sps:$4 sm:$0xff]   ;;  %v2333_v41 = vld [vmem:[%s2686_s6 + $0x64] ss:$8 sps:$4 sm:$0xff]   ;;  %v2337_v43 = vld [vmem:[%s2686_s6 + $0x60] ss:$8 sps:$4 sm:$0xff]  }
  0x50   : > { %803 = vmatpush1.bf16.msra.mxu0 %v2284_v4  ;;  %2188 = vmatpush1.bf16.msra.mxu1 %v2284_v4  ;;  %v2332_v40 = vld [vmem:[%s2686_s6 + $0x150] ss:$8 sps:$4 sm:$0xff]   ;;  %v2335_v42 = vld [vmem:[%s2686_s6 + $0x164] ss:$8 sps:$4 sm:$0xff]   ;;  %v2338_v44 = vld [vmem:[%s2686_s6 + $0x160] ss:$8 sps:$4 sm:$0xff]  }
  0x51   : > { %804 = vmatprep.subr.bf16.mxu0 %v2539_v0  ;;  %2173 = vmatprep.subr.bf16.mxu1 %v2539_v0  ;;  %v2339_v45 = vld [vmem:[%s2686_s6 + $0x74] ss:$8 sps:$4 sm:$0xff]   ;;  %v2343_v47 = vld [vmem:[%s2686_s6 + $0x70] ss:$8 sps:$4 sm:$0xff]   ;;  %v2345_v49 = vld [vmem:[%s2686_s6 + $0x84] ss:$8 sps:$4 sm:$0xff]  }
  0x52   : > { %v2341_v46 = vld [vmem:[%s2686_s6 + $0x174] ss:$8 sps:$4 sm:$0xff]   ;;  %v2344_v48 = vld [vmem:[%s2686_s6 + $0x170] ss:$8 sps:$4 sm:$0xff]   ;;  %v2347_v50 = vld [vmem:[%s2686_s6 + $0x184] ss:$8 sps:$4 sm:$0xff]  }
  0x53   : > { %v2349_v51 = vld [vmem:[%s2686_s6 + $0x80] ss:$8 sps:$4 sm:$0xff]   ;;  %v2351_v53 = vld [vmem:[%s2686_s6 + $0x94] ss:$8 sps:$4 sm:$0xff]   ;;  %v2355_v55 = vld [vmem:[%s2686_s6 + $0x90] ss:$8 sps:$4 sm:$0xff]  }
  0x54   : > { %805 = vmatpush1.bf16.msra.mxu0 %v2285_v5  ;;  %2189 = vmatpush1.bf16.msra.mxu1 %v2285_v5  ;;  %v2350_v52 = vld [vmem:[%s2686_s6 + $0x180] ss:$8 sps:$4 sm:$0xff]   ;;  %v2353_v54 = vld [vmem:[%s2686_s6 + $0x194] ss:$8 sps:$4 sm:$0xff]   ;;  %v2356_v56 = vld [vmem:[%s2686_s6 + $0x190] ss:$8 sps:$4 sm:$0xff]  }
  0x55   : > { %806 = vmatprep.subr.bf16.mxu0 %v2539_v0  ;;  %2174 = vmatprep.subr.bf16.mxu1 %v2539_v0  ;;  %v2357_v57 = vld [vmem:[%s2686_s6 + $0xa4] ss:$8 sps:$4 sm:$0xff]   ;;  %v2361_v59 = vld [vmem:[%s2686_s6 + $0xa0] ss:$8 sps:$4 sm:$0xff]   ;;  %v2363_v61 = vld [vmem:[%s2686_s6 + $0xb4] ss:$8 sps:$4 sm:$0xff]  }
  0x56   : > { %v2359_v58 = vld [vmem:[%s2686_s6 + $0x1a4] ss:$8 sps:$4 sm:$0xff]   ;;  %v2362_v60 = vld [vmem:[%s2686_s6 + $0x1a0] ss:$8 sps:$4 sm:$0xff]   ;;  %v2365_v62 = vld [vmem:[%s2686_s6 + $0x1b4] ss:$8 sps:$4 sm:$0xff]  }
  0x57   : > { %v2367_v63 = vld [vmem:[%s2686_s6 + $0xb0] ss:$8 sps:$4 sm:$0xff]   ;;  %v2369_v1 = vld [vmem:[%s2686_s6 + $0xc4] ss:$8 sps:$4 sm:$0xff]   ;;  %v2373_v3 = vld [vmem:[%s2686_s6 + $0xc0] ss:$8 sps:$4 sm:$0xff]  }
  0x58   : > { %807 = vmatpush1.bf16.msra.mxu0 %v2286_v7  ;;  %2190 = vmatpush1.bf16.msra.mxu1 %v2286_v7  ;;  %v2371_v2 = vld [vmem:[%s2686_s6 + $0x1c4] ss:$8 sps:$4 sm:$0xff]   ;;  %v2374_v4 = vld [vmem:[%s2686_s6 + $0x1c0] ss:$8 sps:$4 sm:$0xff]   ;;  %v2375_v5 = vld [vmem:[%s2686_s6 + $0xd4] ss:$8 sps:$4 sm:$0xff]  }
  0x59   : > { %808 = vmatprep.subr.bf16.mxu0 %v2539_v0  ;;  %2175 = vmatprep.subr.bf16.mxu1 %v2539_v0  ;;  %v2377_v6 = vld [vmem:[%s2686_s6 + $0x1d4] ss:$8 sps:$4 sm:$0xff]   ;;  %v2379_v7 = vld [vmem:[%s2686_s6 + $0xd0] ss:$8 sps:$4 sm:$0xff]   ;;  %s2453_s1 = scalar_lea.vmem %s2452_s30, 8192 }
  0x5a   : > { %v2380_v8 = vld [vmem:[%s2686_s6 + $0x1d0] ss:$8 sps:$4 sm:$0xff]   ;;  %p2455_p0 = scmp.lt.s32.totalorder %s2453_s1, %s2447_s12 }
  0x5c   : > { %809 = vmatpush1.bf16.msra.mxu0 %v2287_v9  ;;  %2191 = vmatpush1.bf16.msra.mxu1 %v2287_v9  ;;  %v2381_v9 = vld [vmem:[%s2686_s6 + $0xe4] ss:$8 sps:$4 sm:$0xff]   ;;  %p2456_p2 = por %p2455_p0, %p2454_p13 }
  0x5d   : > { %810 = vmatprep.subr.bf16.mxu0 %v2539_v0  ;;  %2176 = vmatprep.subr.bf16.mxu1 %v2539_v0 }
  0x5e   : > { %p2457_p3 = pnand %p2456_p2, %p2450_p12 }
  0x60   : > { %811 = vmatpush1.bf16.msra.mxu0 %v2288_v10  ;;  %2192 = vmatpush1.bf16.msra.mxu1 %v2288_v10  ;;  %v2383_v10 = vld [vmem:[%s2686_s6 + $0x1e4] ss:$8 sps:$4 sm:$0xff]  }
  0x61   : > { %812 = vmatprep.subr.bf16.mxu0 %v2539_v0  ;;  %2177 = vmatprep.subr.bf16.mxu1 %v2539_v0 }
  0x64   : > { %813 = vmatpush2.bf16.msra.mxu0 %v2289_v11  ;;  %2193 = vmatpush2.bf16.msra.mxu1 %v2289_v11  ;;  %v2385_v11 = vld [vmem:[%s2686_s6 + $0xe0] ss:$8 sps:$4 sm:$0xff]  }
  0x65   : > { %814 = vmatprep.subr.bf16.mxu0 %v2539_v0  ;;  %2178 = vmatprep.subr.bf16.mxu1 %v2539_v0 }
  0x68   : > { %815 = vmatpush2.bf16.msra.mxu0 %v2290_v12  ;;  %2194 = vmatpush2.bf16.msra.mxu1 %v2290_v12  ;;  %v2386_v12 = vld [vmem:[%s2686_s6 + $0x1e0] ss:$8 sps:$4 sm:$0xff]  }
  0x69   : > { %816 = vmatprep.subr.bf16.mxu0 %v2539_v0  ;;  %2179 = vmatprep.subr.bf16.mxu1 %v2539_v0 }
  0x6c   : > { %817 = vmatpush2.bf16.msra.mxu0 %v2291_v13  ;;  %2195 = vmatpush2.bf16.msra.mxu1 %v2291_v13  ;;  %v2387_v13 = vld [vmem:[%s2686_s6 + $0xf4] ss:$8 sps:$4 sm:$0xff]  }
  0x6d   : > { %818 = vmatprep.subr.bf16.mxu0 %v2539_v0  ;;  %2180 = vmatprep.subr.bf16.mxu1 %v2539_v0 }
  0x70   : > { %819 = vmatpush2.bf16.msra.mxu0 %v2292_v14  ;;  %2196 = vmatpush2.bf16.msra.mxu1 %v2292_v14  ;;  %v2389_v14 = vld [vmem:[%s2686_s6 + $0x1f4] ss:$8 sps:$4 sm:$0xff]  }
  0x71   : > { %820 = vmatprep.subr.bf16.mxu0 %v2539_v0  ;;  %2181 = vmatprep.subr.bf16.mxu1 %v2539_v0 }
  0x74   : > { %821 = vmatpush2.bf16.msra.mxu0 %v2293_v15  ;;  %2197 = vmatpush2.bf16.msra.mxu1 %v2293_v15  ;;  %v2391_v15 = vld [vmem:[%s2686_s6 + $0xf0] ss:$8 sps:$4 sm:$0xff]  }
  0x75   : > { %822 = vmatprep.subr.bf16.mxu0 %v2539_v0  ;;  %2182 = vmatprep.subr.bf16.mxu1 %v2539_v0 }
  0x78   : > { %823 = vmatpush2.bf16.msra.mxu0 %v2294_v16  ;;  %2198 = vmatpush2.bf16.msra.mxu1 %v2294_v16  ;;  %v2392_v16 = vld [vmem:[%s2686_s6 + $0x1f0] ss:$8 sps:$4 sm:$0xff]  }
  0x79   : > { %824 = vmatprep.subr.bf16.mxu0 %v2539_v0  ;;  %2183 = vmatprep.subr.bf16.mxu1 %v2539_v0 }
  0x7c   : > { %825 = vmatpush2.bf16.msra.mxu0 %v2295_v17  ;;  %2199 = vmatpush2.bf16.msra.mxu1 %v2295_v17  ;;  %v2795_v17 = vld [vmem:[%s3021_s2] ss:$0 sm:$0xff] }
  0x7d   : > { %826 = vmatprep.subr.bf16.mxu0 %v2539_v0  ;;  %2184 = vmatprep.subr.bf16.mxu1 %v2539_v0  ;;  %v2368_v0 = vld [vmem:[%s2686_s6 + $0x1b0] ss:$8 sps:$4 sm:$0xff]  }
  0x80   : > { %827 = vmatpush2.bf16.msra.mxu0 %v2296_v18  ;;  %2200 = vmatpush2.bf16.msra.mxu1 %v2296_v18 }
  0x83   : > { %829 = vmatmul.mubr.bf16.vlgmr.msra.gmra.mxu0 %v2297_v19  ;;  %957 = vmatmul.mubr.bf16.vlgmr.msra.gmra.mxu1 %v2300_v20 }
  0x84   : > { %836 = vmatprep.mubr.bf16.mxu0 %v2303_v21  ;;  %964 = vmatprep.mubr.bf16.mxu1 %v2305_v22  ;;  %v2801_v21 = vld [vmem:[%s3022_s3] ss:$0 sm:$0xff] }
  0x8b   : > { %837 = vmatmul.mubr.bf16.gmra.mxu0 %v2307_v23  ;;  %965 = vmatmul.mubr.bf16.gmra.mxu1 %v2308_v24 }
  0x8c   : > { %844 = vmatprep.mubr.bf16.mxu0 %v2309_v25  ;;  %972 = vmatprep.mubr.bf16.mxu1 %v2311_v26 }
  0x93   : > { %845 = vmatmul.mubr.bf16.gmra.mxu0 %v2313_v27  ;;  %973 = vmatmul.mubr.bf16.gmra.mxu1 %v2314_v28 }
  0x94   : > { %852 = vmatprep.mubr.bf16.mxu0 %v2315_v29  ;;  %980 = vmatprep.mubr.bf16.mxu1 %v2317_v30 }
  0x9b   : > { %853 = vmatmul.mubr.bf16.gmra.mxu0 %v2319_v31  ;;  %981 = vmatmul.mubr.bf16.gmra.mxu1 %v2320_v32 }
  0x9c   : > { %860 = vmatprep.mubr.bf16.mxu0 %v2321_v33  ;;  %988 = vmatprep.mubr.bf16.mxu1 %v2323_v34 }
  0xa3   : > { %861 = vmatmul.mubr.bf16.gmra.mxu0 %v2325_v35  ;;  %989 = vmatmul.mubr.bf16.gmra.mxu1 %v2326_v36 }
  0xa4   : > { %868 = vmatprep.mubr.bf16.mxu0 %v2327_v37  ;;  %996 = vmatprep.mubr.bf16.mxu1 %v2329_v38 }
  0xab   : > { %869 = vmatmul.mubr.bf16.gmra.mxu0 %v2331_v39  ;;  %997 = vmatmul.mubr.bf16.gmra.mxu1 %v2332_v40 }
  0xac   : > { %876 = vmatprep.mubr.bf16.mxu0 %v2333_v41  ;;  %1004 = vmatprep.mubr.bf16.mxu1 %v2335_v42 }
  0xb3   : > { %877 = vmatmul.mubr.bf16.gmra.mxu0 %v2337_v43  ;;  %1005 = vmatmul.mubr.bf16.gmra.mxu1 %v2338_v44 }
  0xb4   : > { %884 = vmatprep.mubr.bf16.mxu0 %v2339_v45  ;;  %1012 = vmatprep.mubr.bf16.mxu1 %v2341_v46 }
  0xbb   : > { %885 = vmatmul.mubr.bf16.gmra.mxu0 %v2343_v47  ;;  %1013 = vmatmul.mubr.bf16.gmra.mxu1 %v2344_v48 }
  0xbc   : > { %892 = vmatprep.mubr.bf16.mxu0 %v2345_v49  ;;  %1020 = vmatprep.mubr.bf16.mxu1 %v2347_v50 }
  0xc3   : > { %893 = vmatmul.mubr.bf16.gmra.mxu0 %v2349_v51  ;;  %1021 = vmatmul.mubr.bf16.gmra.mxu1 %v2350_v52 }
  0xc4   : > { %900 = vmatprep.mubr.bf16.mxu0 %v2351_v53  ;;  %1028 = vmatprep.mubr.bf16.mxu1 %v2353_v54 }
  0xcb   : > { %901 = vmatmul.mubr.bf16.gmra.mxu0 %v2355_v55  ;;  %1029 = vmatmul.mubr.bf16.gmra.mxu1 %v2356_v56 }
  0xcc   : > { %908 = vmatprep.mubr.bf16.mxu0 %v2357_v57  ;;  %1036 = vmatprep.mubr.bf16.mxu1 %v2359_v58 }
  0xd3   : > { %909 = vmatmul.mubr.bf16.gmra.mxu0 %v2361_v59  ;;  %1037 = vmatmul.mubr.bf16.gmra.mxu1 %v2362_v60 }
  0xd4   : > { %916 = vmatprep.mubr.bf16.mxu0 %v2363_v61  ;;  %1044 = vmatprep.mubr.bf16.mxu1 %v2365_v62 }
  0xdb   : > { %917 = vmatmul.mubr.bf16.gmra.mxu0 %v2367_v63  ;;  %1045 = vmatmul.mubr.bf16.gmra.mxu1 %v2368_v0 }
  0xdc   : > { %924 = vmatprep.mubr.bf16.mxu0 %v2369_v1  ;;  %1052 = vmatprep.mubr.bf16.mxu1 %v2371_v2 }
  0xe3   : > { %925 = vmatmul.mubr.bf16.gmra.mxu0 %v2373_v3  ;;  %1053 = vmatmul.mubr.bf16.gmra.mxu1 %v2374_v4 }
  0xe4   : > { %932 = vmatprep.mubr.bf16.mxu0 %v2375_v5  ;;  %1060 = vmatprep.mubr.bf16.mxu1 %v2377_v6 }
  0xeb   : > { %933 = vmatmul.mubr.bf16.gmra.mxu0 %v2379_v7  ;;  %1061 = vmatmul.mubr.bf16.gmra.mxu1 %v2380_v8 }
  0xec   : > { %940 = vmatprep.mubr.bf16.mxu0 %v2381_v9  ;;  %1068 = vmatprep.mubr.bf16.mxu1 %v2383_v10 }
  0xf3   : > { %941 = vmatmul.mubr.bf16.gmra.mxu0 %v2385_v11  ;;  %1069 = vmatmul.mubr.bf16.gmra.mxu1 %v2386_v12 }
  0xf4   : > { %948 = vmatprep.mubr.bf16.mxu0 %v2387_v13  ;;  %1076 = vmatprep.mubr.bf16.mxu1 %v2389_v14 }
  0xfb   : > { %949 = vmatmul.mubr.bf16.gmra.mxu0 %v2391_v15  ;;  %1077 = vmatmul.mubr.bf16.gmra.mxu1 %v2392_v16 }
 0x143   : > { %v830_v18 = vpop.f32.mrf.mxu0  ;;  %v958_v19 = vpop.f32.mrf.mxu1 }
 0x144   : > { %v1092_v20 = vmul.f32 %v2795_v17, %v830_v18  ;;  %v1124_v22 = vmul.f32 %v2795_v17, %v958_v19 }
 0x145   : > { %v832_v23 = vpop.f32.mrf.mxu0  ;;  %v960_v24 = vpop.f32.mrf.mxu1 }
 0x146   : > { %v1163_v25 = vadd.f32 %v2801_v21, %v1092_v20  ;;  %v1195_v26 = vadd.f32 %v2801_v21, %v1124_v22 }
 0x147   : > { %v833_v27 = vpop.f32.mrf.mxu0  ;;  %v961_v28 = vpop.f32.mrf.mxu1 }
 0x148   : > { %v1093_v29 = vmul.f32 %v2795_v17, %v833_v27  ;;  %v1125_v30 = vmul.f32 %v2795_v17, %v961_v28  ;;  %v1227_v35 = vmax.f32 %v1163_v25, 0.0  ;;  %v1259_v36 = vmax.f32 %v1195_v26, 0.0 }
 0x149   : > { %v835_v31 = vpop.f32.mrf.mxu0  ;;  %v963_v32 = vpop.f32.mrf.mxu1 }
 0x14a   : > { %v1164_v33 = vadd.f32 %v2801_v21, %v1093_v29  ;;  %v1196_v34 = vadd.f32 %v2801_v21, %v1125_v30 }
 0x14b   : > { %v838_v37 = vpop.f32.mrf.mxu0  ;;  %v966_v38 = vpop.f32.mrf.mxu1 }
 0x14c   : > { %v1228_v39 = vmax.f32 %v1164_v33, 0.0  ;;  %v1260_v40 = vmax.f32 %v1196_v34, 0.0  ;;  %v1094_v41 = vmul.f32 %v2795_v17, %v838_v37  ;;  %v1126_v42 = vmul.f32 %v2795_v17, %v966_v38 }
 0x14d   : > { %v840_v43 = vpop.f32.mrf.mxu0  ;;  %v968_v44 = vpop.f32.mrf.mxu1 }
 0x14e   : > { %v1981_v45 = vpack.c.bf16 %v1228_v39, %v1227_v35  ;;  %v2061_v46 = vpack.c.bf16 %v1260_v40, %v1259_v36  ;;  %v1165_v47 = vadd.f32 %v2801_v21, %v1094_v41  ;;  %v1197_v48 = vadd.f32 %v2801_v21, %v1126_v42 }
 0x14f   : > { %v841_v49 = vpop.f32.mrf.mxu0  ;;  %v969_v50 = vpop.f32.mrf.mxu1 }
 0x150   : > { %1982 = vst [vmem:[%s2815_s9] sm:$0xff] %v1981_v45   ;;  %2153 = vst [vmem:[%s2815_s9 + $0x80] sm:$0xff] %v2061_v46   ;;  %v1095_v51 = vmul.f32 %v2795_v17, %v841_v49  ;;  %v1127_v52 = vmul.f32 %v2795_v17, %v969_v50  ;;  %v1229_v57 = vmax.f32 %v1165_v47, 0.0  ;;  %v1261_v58 = vmax.f32 %v1197_v48, 0.0 }
 0x151   : > { %v843_v53 = vpop.f32.mrf.mxu0  ;;  %v971_v54 = vpop.f32.mrf.mxu1 }
 0x152   : > { %v1166_v55 = vadd.f32 %v2801_v21, %v1095_v51  ;;  %v1198_v56 = vadd.f32 %v2801_v21, %v1127_v52 }
 0x153   : > { %v846_v59 = vpop.f32.mrf.mxu0  ;;  %v974_v60 = vpop.f32.mrf.mxu1 }
 0x154   : > { %v1230_v61 = vmax.f32 %v1166_v55, 0.0  ;;  %v1262_v62 = vmax.f32 %v1198_v56, 0.0  ;;  %v1096_v63 = vmul.f32 %v2795_v17, %v846_v59  ;;  %v1128_v0 = vmul.f32 %v2795_v17, %v974_v60 }
 0x155   : > { %v848_v1 = vpop.f32.mrf.mxu0  ;;  %v976_v2 = vpop.f32.mrf.mxu1 }
 0x156   : > { %v1986_v3 = vpack.c.bf16 %v1230_v61, %v1229_v57  ;;  %v2066_v4 = vpack.c.bf16 %v1262_v62, %v1261_v58  ;;  %v1167_v5 = vadd.f32 %v2801_v21, %v1096_v63  ;;  %v1199_v6 = vadd.f32 %v2801_v21, %v1128_v0 }
 0x157   : > { %v849_v7 = vpop.f32.mrf.mxu0  ;;  %v977_v8 = vpop.f32.mrf.mxu1 }
 0x158   : > { %2138 = vst [vmem:[%s2815_s9 + $0x8] sm:$0xff] %v1986_v3   ;;  %2154 = vst [vmem:[%s2815_s9 + $0x88] sm:$0xff] %v2066_v4   ;;  %v1097_v9 = vmul.f32 %v2795_v17, %v849_v7  ;;  %v1129_v10 = vmul.f32 %v2795_v17, %v977_v8  ;;  %v1231_v15 = vmax.f32 %v1167_v5, 0.0  ;;  %v1263_v16 = vmax.f32 %v1199_v6, 0.0 }
 0x159   : > { %v851_v11 = vpop.f32.mrf.mxu0  ;;  %v979_v12 = vpop.f32.mrf.mxu1 }
 0x15a   : > { %v1168_v13 = vadd.f32 %v2801_v21, %v1097_v9  ;;  %v1200_v14 = vadd.f32 %v2801_v21, %v1129_v10 }
 0x15b   : > { %v854_v18 = vpop.f32.mrf.mxu0  ;;  %v982_v19 = vpop.f32.mrf.mxu1 }
 0x15c   : > { %v1232_v20 = vmax.f32 %v1168_v13, 0.0  ;;  %v1264_v22 = vmax.f32 %v1200_v14, 0.0  ;;  %v1098_v23 = vmul.f32 %v2795_v17, %v854_v18  ;;  %v1130_v24 = vmul.f32 %v2795_v17, %v982_v19 }
 0x15d   : > { %v856_v25 = vpop.f32.mrf.mxu0  ;;  %v984_v26 = vpop.f32.mrf.mxu1 }
 0x15e   : > { %v1991_v27 = vpack.c.bf16 %v1232_v20, %v1231_v15  ;;  %v2071_v28 = vpack.c.bf16 %v1264_v22, %v1263_v16  ;;  %v1169_v29 = vadd.f32 %v2801_v21, %v1098_v23  ;;  %v1201_v30 = vadd.f32 %v2801_v21, %v1130_v24 }
 0x15f   : > { %v857_v31 = vpop.f32.mrf.mxu0  ;;  %v985_v32 = vpop.f32.mrf.mxu1 }
 0x160   : > { %2139 = vst [vmem:[%s2815_s9 + $0x10] sm:$0xff] %v1991_v27   ;;  %2155 = vst [vmem:[%s2815_s9 + $0x90] sm:$0xff] %v2071_v28   ;;  %v1099_v33 = vmul.f32 %v2795_v17, %v857_v31  ;;  %v1131_v34 = vmul.f32 %v2795_v17, %v985_v32  ;;  %v1233_v39 = vmax.f32 %v1169_v29, 0.0  ;;  %v1265_v40 = vmax.f32 %v1201_v30, 0.0 }
 0x161   : > { %v859_v35 = vpop.f32.mrf.mxu0  ;;  %v987_v36 = vpop.f32.mrf.mxu1 }
 0x162   : > { %v1170_v37 = vadd.f32 %v2801_v21, %v1099_v33  ;;  %v1202_v38 = vadd.f32 %v2801_v21, %v1131_v34 }
 0x163   : > { %v862_v41 = vpop.f32.mrf.mxu0  ;;  %v990_v42 = vpop.f32.mrf.mxu1 }
 0x164   : > { %v1234_v43 = vmax.f32 %v1170_v37, 0.0  ;;  %v1266_v44 = vmax.f32 %v1202_v38, 0.0  ;;  %v1100_v45 = vmul.f32 %v2795_v17, %v862_v41  ;;  %v1132_v46 = vmul.f32 %v2795_v17, %v990_v42 }
 0x165   : > { %v864_v47 = vpop.f32.mrf.mxu0  ;;  %v992_v48 = vpop.f32.mrf.mxu1 }
 0x166   : > { %v1996_v49 = vpack.c.bf16 %v1234_v43, %v1233_v39  ;;  %v2076_v50 = vpack.c.bf16 %v1266_v44, %v1265_v40  ;;  %v1171_v51 = vadd.f32 %v2801_v21, %v1100_v45  ;;  %v1203_v52 = vadd.f32 %v2801_v21, %v1132_v46 }
 0x167   : > { %v865_v53 = vpop.f32.mrf.mxu0  ;;  %v993_v54 = vpop.f32.mrf.mxu1 }
 0x168   : > { %2140 = vst [vmem:[%s2815_s9 + $0x18] sm:$0xff] %v1996_v49   ;;  %2156 = vst [vmem:[%s2815_s9 + $0x98] sm:$0xff] %v2076_v50   ;;  %v1101_v55 = vmul.f32 %v2795_v17, %v865_v53  ;;  %v1133_v56 = vmul.f32 %v2795_v17, %v993_v54  ;;  %v1235_v61 = vmax.f32 %v1171_v51, 0.0  ;;  %v1267_v62 = vmax.f32 %v1203_v52, 0.0 }
 0x169   : > { %v867_v57 = vpop.f32.mrf.mxu0  ;;  %v995_v58 = vpop.f32.mrf.mxu1 }
 0x16a   : > { %v1172_v59 = vadd.f32 %v2801_v21, %v1101_v55  ;;  %v1204_v60 = vadd.f32 %v2801_v21, %v1133_v56 }
 0x16b   : > { %v870_v63 = vpop.f32.mrf.mxu0  ;;  %v998_v0 = vpop.f32.mrf.mxu1 }
 0x16c   : > { %v1236_v1 = vmax.f32 %v1172_v59, 0.0  ;;  %v1268_v2 = vmax.f32 %v1204_v60, 0.0  ;;  %v1102_v3 = vmul.f32 %v2795_v17, %v870_v63  ;;  %v1134_v4 = vmul.f32 %v2795_v17, %v998_v0 }
 0x16d   : > { %v872_v5 = vpop.f32.mrf.mxu0  ;;  %v1000_v6 = vpop.f32.mrf.mxu1 }
 0x16e   : > { %v2001_v7 = vpack.c.bf16 %v1236_v1, %v1235_v61  ;;  %v2081_v8 = vpack.c.bf16 %v1268_v2, %v1267_v62  ;;  %v1173_v9 = vadd.f32 %v2801_v21, %v1102_v3  ;;  %v1205_v10 = vadd.f32 %v2801_v21, %v1134_v4 }
 0x16f   : > { %v873_v11 = vpop.f32.mrf.mxu0  ;;  %v1001_v12 = vpop.f32.mrf.mxu1 }
 0x170   : > { %2141 = vst [vmem:[%s2815_s9 + $0x20] sm:$0xff] %v2001_v7   ;;  %2157 = vst [vmem:[%s2815_s9 + $0xa0] sm:$0xff] %v2081_v8   ;;  %v1103_v13 = vmul.f32 %v2795_v17, %v873_v11  ;;  %v1135_v14 = vmul.f32 %v2795_v17, %v1001_v12  ;;  %v1237_v20 = vmax.f32 %v1173_v9, 0.0  ;;  %v1269_v22 = vmax.f32 %v1205_v10, 0.0 }
 0x171   : > { %v875_v15 = vpop.f32.mrf.mxu0  ;;  %v1003_v16 = vpop.f32.mrf.mxu1 }
 0x172   : > { %v1174_v18 = vadd.f32 %v2801_v21, %v1103_v13  ;;  %v1206_v19 = vadd.f32 %v2801_v21, %v1135_v14 }
 0x173   : > { %v878_v23 = vpop.f32.mrf.mxu0  ;;  %v1006_v24 = vpop.f32.mrf.mxu1 }
 0x174   : > { %v1238_v25 = vmax.f32 %v1174_v18, 0.0  ;;  %v1270_v26 = vmax.f32 %v1206_v19, 0.0  ;;  %v1104_v27 = vmul.f32 %v2795_v17, %v878_v23  ;;  %v1136_v28 = vmul.f32 %v2795_v17, %v1006_v24 }
 0x175   : > { %v880_v29 = vpop.f32.mrf.mxu0  ;;  %v1008_v30 = vpop.f32.mrf.mxu1 }
 0x176   : > { %v2006_v31 = vpack.c.bf16 %v1238_v25, %v1237_v20  ;;  %v2086_v32 = vpack.c.bf16 %v1270_v26, %v1269_v22  ;;  %v1175_v33 = vadd.f32 %v2801_v21, %v1104_v27  ;;  %v1207_v34 = vadd.f32 %v2801_v21, %v1136_v28 }
 0x177   : > { %v881_v35 = vpop.f32.mrf.mxu0  ;;  %v1009_v36 = vpop.f32.mrf.mxu1 }
 0x178   : > { %2142 = vst [vmem:[%s2815_s9 + $0x28] sm:$0xff] %v2006_v31   ;;  %2158 = vst [vmem:[%s2815_s9 + $0xa8] sm:$0xff] %v2086_v32   ;;  %v1105_v37 = vmul.f32 %v2795_v17, %v881_v35  ;;  %v1137_v38 = vmul.f32 %v2795_v17, %v1009_v36  ;;  %v1239_v43 = vmax.f32 %v1175_v33, 0.0  ;;  %v1271_v44 = vmax.f32 %v1207_v34, 0.0 }
 0x179   : > { %v883_v39 = vpop.f32.mrf.mxu0  ;;  %v1011_v40 = vpop.f32.mrf.mxu1 }
 0x17a   : > { %v1176_v41 = vadd.f32 %v2801_v21, %v1105_v37  ;;  %v1208_v42 = vadd.f32 %v2801_v21, %v1137_v38 }
 0x17b   : > { %v886_v45 = vpop.f32.mrf.mxu0  ;;  %v1014_v46 = vpop.f32.mrf.mxu1 }
 0x17c   : > { %v1240_v47 = vmax.f32 %v1176_v41, 0.0  ;;  %v1272_v48 = vmax.f32 %v1208_v42, 0.0  ;;  %v1106_v49 = vmul.f32 %v2795_v17, %v886_v45  ;;  %v1138_v50 = vmul.f32 %v2795_v17, %v1014_v46 }
 0x17d   : > { %v888_v51 = vpop.f32.mrf.mxu0  ;;  %v1016_v52 = vpop.f32.mrf.mxu1 }
 0x17e   : > { %v2011_v53 = vpack.c.bf16 %v1240_v47, %v1239_v43  ;;  %v2091_v54 = vpack.c.bf16 %v1272_v48, %v1271_v44  ;;  %v1177_v55 = vadd.f32 %v2801_v21, %v1106_v49  ;;  %v1209_v56 = vadd.f32 %v2801_v21, %v1138_v50 }
 0x17f   : > { %v889_v57 = vpop.f32.mrf.mxu0  ;;  %v1017_v58 = vpop.f32.mrf.mxu1 }
 0x180   : > { %2143 = vst [vmem:[%s2815_s9 + $0x30] sm:$0xff] %v2011_v53   ;;  %2159 = vst [vmem:[%s2815_s9 + $0xb0] sm:$0xff] %v2091_v54   ;;  %v1107_v59 = vmul.f32 %v2795_v17, %v889_v57  ;;  %v1139_v60 = vmul.f32 %v2795_v17, %v1017_v58  ;;  %v1241_v1 = vmax.f32 %v1177_v55, 0.0  ;;  %v1273_v2 = vmax.f32 %v1209_v56, 0.0 }
 0x181   : > { %v891_v61 = vpop.f32.mrf.mxu0  ;;  %v1019_v62 = vpop.f32.mrf.mxu1 }
 0x182   : > { %v1178_v63 = vadd.f32 %v2801_v21, %v1107_v59  ;;  %v1210_v0 = vadd.f32 %v2801_v21, %v1139_v60 }
 0x183   : > { %v894_v3 = vpop.f32.mrf.mxu0  ;;  %v1022_v4 = vpop.f32.mrf.mxu1 }
 0x184   : > { %v1242_v5 = vmax.f32 %v1178_v63, 0.0  ;;  %v1274_v6 = vmax.f32 %v1210_v0, 0.0  ;;  %v1108_v7 = vmul.f32 %v2795_v17, %v894_v3  ;;  %v1140_v8 = vmul.f32 %v2795_v17, %v1022_v4 }
 0x185   : > { %v896_v9 = vpop.f32.mrf.mxu0  ;;  %v1024_v10 = vpop.f32.mrf.mxu1 }
 0x186   : > { %v2016_v11 = vpack.c.bf16 %v1242_v5, %v1241_v1  ;;  %v2096_v12 = vpack.c.bf16 %v1274_v6, %v1273_v2  ;;  %v1179_v13 = vadd.f32 %v2801_v21, %v1108_v7  ;;  %v1211_v14 = vadd.f32 %v2801_v21, %v1140_v8 }
 0x187   : > { %v897_v15 = vpop.f32.mrf.mxu0  ;;  %v1025_v16 = vpop.f32.mrf.mxu1 }
 0x188   : > { %2144 = vst [vmem:[%s2815_s9 + $0x38] sm:$0xff] %v2016_v11   ;;  %2160 = vst [vmem:[%s2815_s9 + $0xb8] sm:$0xff] %v2096_v12   ;;  %v1109_v18 = vmul.f32 %v2795_v17, %v897_v15  ;;  %v1141_v19 = vmul.f32 %v2795_v17, %v1025_v16  ;;  %v1243_v25 = vmax.f32 %v1179_v13, 0.0  ;;  %v1275_v26 = vmax.f32 %v1211_v14, 0.0 }
 0x189   : > { %v899_v20 = vpop.f32.mrf.mxu0  ;;  %v1027_v22 = vpop.f32.mrf.mxu1 }
 0x18a   : > { %v1180_v23 = vadd.f32 %v2801_v21, %v1109_v18  ;;  %v1212_v24 = vadd.f32 %v2801_v21, %v1141_v19 }
 0x18b   : > { %v902_v27 = vpop.f32.mrf.mxu0  ;;  %v1030_v28 = vpop.f32.mrf.mxu1 }
 0x18c   : > { %v1244_v29 = vmax.f32 %v1180_v23, 0.0  ;;  %v1276_v30 = vmax.f32 %v1212_v24, 0.0  ;;  %v1110_v31 = vmul.f32 %v2795_v17, %v902_v27  ;;  %v1142_v32 = vmul.f32 %v2795_v17, %v1030_v28 }
 0x18d   : > { %v904_v33 = vpop.f32.mrf.mxu0  ;;  %v1032_v34 = vpop.f32.mrf.mxu1 }
 0x18e   : > { %v2021_v35 = vpack.c.bf16 %v1244_v29, %v1243_v25  ;;  %v2101_v36 = vpack.c.bf16 %v1276_v30, %v1275_v26  ;;  %v1181_v37 = vadd.f32 %v2801_v21, %v1110_v31  ;;  %v1213_v38 = vadd.f32 %v2801_v21, %v1142_v32 }
 0x18f   : > { %v905_v39 = vpop.f32.mrf.mxu0  ;;  %v1033_v40 = vpop.f32.mrf.mxu1 }
 0x190   : > { %2145 = vst [vmem:[%s2815_s9 + $0x40] sm:$0xff] %v2021_v35   ;;  %2161 = vst [vmem:[%s2815_s9 + $0xc0] sm:$0xff] %v2101_v36   ;;  %v1111_v41 = vmul.f32 %v2795_v17, %v905_v39  ;;  %v1143_v42 = vmul.f32 %v2795_v17, %v1033_v40  ;;  %v1245_v47 = vmax.f32 %v1181_v37, 0.0  ;;  %v1277_v48 = vmax.f32 %v1213_v38, 0.0 }
 0x191   : > { %v907_v43 = vpop.f32.mrf.mxu0  ;;  %v1035_v44 = vpop.f32.mrf.mxu1 }
 0x192   : > { %v1182_v45 = vadd.f32 %v2801_v21, %v1111_v41  ;;  %v1214_v46 = vadd.f32 %v2801_v21, %v1143_v42 }
 0x193   : > { %v910_v49 = vpop.f32.mrf.mxu0  ;;  %v1038_v50 = vpop.f32.mrf.mxu1 }
 0x194   : > { %v1246_v51 = vmax.f32 %v1182_v45, 0.0  ;;  %v1278_v52 = vmax.f32 %v1214_v46, 0.0  ;;  %v1112_v53 = vmul.f32 %v2795_v17, %v910_v49  ;;  %v1144_v54 = vmul.f32 %v2795_v17, %v1038_v50 }
 0x195   : > { %v912_v55 = vpop.f32.mrf.mxu0  ;;  %v1040_v56 = vpop.f32.mrf.mxu1 }
 0x196   : > { %v2026_v57 = vpack.c.bf16 %v1246_v51, %v1245_v47  ;;  %v2106_v58 = vpack.c.bf16 %v1278_v52, %v1277_v48  ;;  %v1183_v59 = vadd.f32 %v2801_v21, %v1112_v53  ;;  %v1215_v60 = vadd.f32 %v2801_v21, %v1144_v54 }
 0x197   : > { %v913_v61 = vpop.f32.mrf.mxu0  ;;  %v1041_v62 = vpop.f32.mrf.mxu1 }
 0x198   : > { %2146 = vst [vmem:[%s2815_s9 + $0x48] sm:$0xff] %v2026_v57   ;;  %2162 = vst [vmem:[%s2815_s9 + $0xc8] sm:$0xff] %v2106_v58   ;;  %v1113_v63 = vmul.f32 %v2795_v17, %v913_v61  ;;  %v1145_v0 = vmul.f32 %v2795_v17, %v1041_v62  ;;  %v1247_v5 = vmax.f32 %v1183_v59, 0.0  ;;  %v1279_v6 = vmax.f32 %v1215_v60, 0.0 }
 0x199   : > { %v915_v1 = vpop.f32.mrf.mxu0  ;;  %v1043_v2 = vpop.f32.mrf.mxu1 }
 0x19a   : > { %v1184_v3 = vadd.f32 %v2801_v21, %v1113_v63  ;;  %v1216_v4 = vadd.f32 %v2801_v21, %v1145_v0 }
 0x19b   : > { %v918_v7 = vpop.f32.mrf.mxu0  ;;  %v1046_v8 = vpop.f32.mrf.mxu1 }
 0x19c   : > { %v1248_v9 = vmax.f32 %v1184_v3, 0.0  ;;  %v1280_v10 = vmax.f32 %v1216_v4, 0.0  ;;  %v1114_v11 = vmul.f32 %v2795_v17, %v918_v7  ;;  %v1146_v12 = vmul.f32 %v2795_v17, %v1046_v8 }
 0x19d   : > { %v920_v13 = vpop.f32.mrf.mxu0  ;;  %v1048_v14 = vpop.f32.mrf.mxu1 }
 0x19e   : > { %v2031_v15 = vpack.c.bf16 %v1248_v9, %v1247_v5  ;;  %v2111_v16 = vpack.c.bf16 %v1280_v10, %v1279_v6  ;;  %v1185_v18 = vadd.f32 %v2801_v21, %v1114_v11  ;;  %v1217_v19 = vadd.f32 %v2801_v21, %v1146_v12 }
 0x19f   : > { %v921_v20 = vpop.f32.mrf.mxu0  ;;  %v1049_v22 = vpop.f32.mrf.mxu1 }
 0x1a0   : > { %2147 = vst [vmem:[%s2815_s9 + $0x50] sm:$0xff] %v2031_v15   ;;  %2163 = vst [vmem:[%s2815_s9 + $0xd0] sm:$0xff] %v2111_v16   ;;  %v1115_v23 = vmul.f32 %v2795_v17, %v921_v20  ;;  %v1147_v24 = vmul.f32 %v2795_v17, %v1049_v22  ;;  %v1249_v29 = vmax.f32 %v1185_v18, 0.0  ;;  %v1281_v30 = vmax.f32 %v1217_v19, 0.0 }
 0x1a1   : > { %v923_v25 = vpop.f32.mrf.mxu0  ;;  %v1051_v26 = vpop.f32.mrf.mxu1 }
 0x1a2   : > { %v1186_v27 = vadd.f32 %v2801_v21, %v1115_v23  ;;  %v1218_v28 = vadd.f32 %v2801_v21, %v1147_v24 }
 0x1a3   : > { %v926_v31 = vpop.f32.mrf.mxu0  ;;  %v1054_v32 = vpop.f32.mrf.mxu1 }
 0x1a4   : > { %v1250_v33 = vmax.f32 %v1186_v27, 0.0  ;;  %v1282_v34 = vmax.f32 %v1218_v28, 0.0  ;;  %v1116_v35 = vmul.f32 %v2795_v17, %v926_v31  ;;  %v1148_v36 = vmul.f32 %v2795_v17, %v1054_v32 }
 0x1a5   : > { %v928_v37 = vpop.f32.mrf.mxu0  ;;  %v1056_v38 = vpop.f32.mrf.mxu1 }
 0x1a6   : > { %v2036_v39 = vpack.c.bf16 %v1250_v33, %v1249_v29  ;;  %v2116_v40 = vpack.c.bf16 %v1282_v34, %v1281_v30  ;;  %v1187_v41 = vadd.f32 %v2801_v21, %v1116_v35  ;;  %v1219_v42 = vadd.f32 %v2801_v21, %v1148_v36 }
 0x1a7   : > { %v929_v43 = vpop.f32.mrf.mxu0  ;;  %v1057_v44 = vpop.f32.mrf.mxu1 }
 0x1a8   : > { %2148 = vst [vmem:[%s2815_s9 + $0x58] sm:$0xff] %v2036_v39   ;;  %2164 = vst [vmem:[%s2815_s9 + $0xd8] sm:$0xff] %v2116_v40   ;;  %v1117_v45 = vmul.f32 %v2795_v17, %v929_v43  ;;  %v1149_v46 = vmul.f32 %v2795_v17, %v1057_v44  ;;  %v1251_v51 = vmax.f32 %v1187_v41, 0.0  ;;  %v1283_v52 = vmax.f32 %v1219_v42, 0.0 }
 0x1a9   : > { %v931_v47 = vpop.f32.mrf.mxu0  ;;  %v1059_v48 = vpop.f32.mrf.mxu1 }
 0x1aa   : > { %v1188_v49 = vadd.f32 %v2801_v21, %v1117_v45  ;;  %v1220_v50 = vadd.f32 %v2801_v21, %v1149_v46 }
 0x1ab   : > { %v934_v53 = vpop.f32.mrf.mxu0  ;;  %v1062_v54 = vpop.f32.mrf.mxu1 }
 0x1ac   : > { %v1252_v55 = vmax.f32 %v1188_v49, 0.0  ;;  %v1284_v56 = vmax.f32 %v1220_v50, 0.0  ;;  %v1118_v57 = vmul.f32 %v2795_v17, %v934_v53  ;;  %v1150_v58 = vmul.f32 %v2795_v17, %v1062_v54 }
 0x1ad   : > { %v936_v59 = vpop.f32.mrf.mxu0  ;;  %v1064_v60 = vpop.f32.mrf.mxu1 }
 0x1ae   : > { %v2041_v61 = vpack.c.bf16 %v1252_v55, %v1251_v51  ;;  %v2121_v62 = vpack.c.bf16 %v1284_v56, %v1283_v52  ;;  %v1189_v63 = vadd.f32 %v2801_v21, %v1118_v57  ;;  %v1221_v0 = vadd.f32 %v2801_v21, %v1150_v58 }
 0x1af   : > { %v937_v1 = vpop.f32.mrf.mxu0  ;;  %v1065_v2 = vpop.f32.mrf.mxu1 }
 0x1b0   : > { %2149 = vst [vmem:[%s2815_s9 + $0x60] sm:$0xff] %v2041_v61   ;;  %2165 = vst [vmem:[%s2815_s9 + $0xe0] sm:$0xff] %v2121_v62   ;;  %v1119_v3 = vmul.f32 %v2795_v17, %v937_v1  ;;  %v1151_v4 = vmul.f32 %v2795_v17, %v1065_v2  ;;  %v1253_v9 = vmax.f32 %v1189_v63, 0.0  ;;  %v1285_v10 = vmax.f32 %v1221_v0, 0.0 }
 0x1b1   : > { %v939_v5 = vpop.f32.mrf.mxu0  ;;  %v1067_v6 = vpop.f32.mrf.mxu1 }
 0x1b2   : > { %v1190_v7 = vadd.f32 %v2801_v21, %v1119_v3  ;;  %v1222_v8 = vadd.f32 %v2801_v21, %v1151_v4 }
 0x1b3   : > { %v942_v11 = vpop.f32.mrf.mxu0  ;;  %v1070_v12 = vpop.f32.mrf.mxu1 }
 0x1b4   : > { %v1254_v13 = vmax.f32 %v1190_v7, 0.0  ;;  %v1286_v14 = vmax.f32 %v1222_v8, 0.0  ;;  %v1120_v15 = vmul.f32 %v2795_v17, %v942_v11  ;;  %v1152_v16 = vmul.f32 %v2795_v17, %v1070_v12 }
 0x1b5   : > { %v944_v18 = vpop.f32.mrf.mxu0  ;;  %v1072_v19 = vpop.f32.mrf.mxu1 }
 0x1b6   : > { %v2046_v20 = vpack.c.bf16 %v1254_v13, %v1253_v9  ;;  %v2126_v22 = vpack.c.bf16 %v1286_v14, %v1285_v10  ;;  %v1191_v23 = vadd.f32 %v2801_v21, %v1120_v15  ;;  %v1223_v24 = vadd.f32 %v2801_v21, %v1152_v16 }
 0x1b7   : > { %v945_v25 = vpop.f32.mrf.mxu0  ;;  %v1073_v26 = vpop.f32.mrf.mxu1 }
 0x1b8   : > { %2150 = vst [vmem:[%s2815_s9 + $0x68] sm:$0xff] %v2046_v20   ;;  %2166 = vst [vmem:[%s2815_s9 + $0xe8] sm:$0xff] %v2126_v22   ;;  %v1121_v27 = vmul.f32 %v2795_v17, %v945_v25  ;;  %v1153_v28 = vmul.f32 %v2795_v17, %v1073_v26  ;;  %v1255_v33 = vmax.f32 %v1191_v23, 0.0  ;;  %v1287_v34 = vmax.f32 %v1223_v24, 0.0 }
 0x1b9   : > { %v947_v29 = vpop.f32.mrf.mxu0  ;;  %v1075_v30 = vpop.f32.mrf.mxu1 }
 0x1ba   : > { %v1192_v31 = vadd.f32 %v2801_v21, %v1121_v27  ;;  %v1224_v32 = vadd.f32 %v2801_v21, %v1153_v28 }
 0x1bb   : > { %v950_v35 = vpop.f32.mrf.mxu0  ;;  %v1078_v36 = vpop.f32.mrf.mxu1 }
 0x1bc   : > { %v1256_v37 = vmax.f32 %v1192_v31, 0.0  ;;  %v1288_v38 = vmax.f32 %v1224_v32, 0.0  ;;  %v1122_v39 = vmul.f32 %v2795_v17, %v950_v35  ;;  %v1154_v40 = vmul.f32 %v2795_v17, %v1078_v36 }
 0x1bd   : > { %v952_v41 = vpop.f32.mrf.mxu0  ;;  %v1080_v42 = vpop.f32.mrf.mxu1 }
 0x1be   : > { %v2051_v43 = vpack.c.bf16 %v1256_v37, %v1255_v33  ;;  %v2131_v44 = vpack.c.bf16 %v1288_v38, %v1287_v34  ;;  %v1193_v47 = vadd.f32 %v2801_v21, %v1122_v39  ;;  %v1225_v48 = vadd.f32 %v2801_v21, %v1154_v40 }
 0x1bf   : > { %v953_v45 = vpop.f32.mrf.mxu0  ;;  %v1081_v46 = vpop.f32.mrf.mxu1 }
 0x1c0   : > { %2151 = vst [vmem:[%s2815_s9 + $0x70] sm:$0xff] %v2051_v43   ;;  %2167 = vst [vmem:[%s2815_s9 + $0xf0] sm:$0xff] %v2131_v44   ;;  %v1123_v49 = vmul.f32 %v2795_v17, %v953_v45  ;;  %v1155_v50 = vmul.f32 %v2795_v17, %v1081_v46  ;;  %v1257_v55 = vmax.f32 %v1193_v47, 0.0  ;;  %v1289_v56 = vmax.f32 %v1225_v48, 0.0 }
 0x1c1   : > { %v955_v51 = vpop.f32.mrf.mxu0  ;;  %v1083_v52 = vpop.f32.mrf.mxu1 }
 0x1c2   : > { %v1194_v53 = vadd.f32 %v2801_v21, %v1123_v49  ;;  %v1226_v54 = vadd.f32 %v2801_v21, %v1155_v50 }
 0x1c4   : > { %v1258_v57 = vmax.f32 %v1194_v53, 0.0  ;;  %v1290_v58 = vmax.f32 %v1226_v54, 0.0 }
 0x1c6   : > { %v2056_v17 = vpack.c.bf16 %v1258_v57, %v1257_v55  ;;  %v2136_v59 = vpack.c.bf16 %v1290_v58, %v1289_v56 }
 0x1c8   : > { %2152 = vst [vmem:[%s2815_s9 + $0x78] sm:$0xff] %v2056_v17   ;;  %2168 = vst [vmem:[%s2815_s9 + $0xf8] sm:$0xff] %v2136_v59  }
 0x1c9   : > { %2460 = shalt.err (!%p2457_p3)
}
 0x1ca   : > { %s2461_s6 = scalar_lea.hbm %s2968_s29, 4096  ;;  %s2465_s27 = scalar_lea.hbm %s3023_s4, 16384 }
 0x1cb   : > { %p2462_p5 = scmp.ne.s32.totalorder %s2968_s29, %s2461_s6  ;;  %p2466_p6 = scmp.lt.s32.totalorder %s2968_s29, %s3023_s4 }
 0x1cc   : > { %p2467_p11 = scmp.lt.s32.totalorder %s2465_s27, %s2461_s6 }
 0x1cd   : > { %p2463_p7 = pnand %p2462_p5, %p3036_p4 }
 0x1ce   : > { %p2468_p10 = por %p2467_p11, %p2466_p6 }
 0x1cf   : > { %p2464_p9 = pneg %p2463_p7 }
 0x1d1   : > { %p2469_p1 = pnand %p2468_p10, %p2464_p9 }
 0x1d3   : > { %2472 = shalt.err (!%p2469_p1)
}
 0x1d4   : > { %s2541_s9 = smov 64   ;;  %s2542_s24 = smov 4  }
 0x1d5   : > { %2207 = dma.vmem_to_hbm [thread:$0]  (%p3036_p4), %s2970_s10, 4096, %s2968_s29, %s1612_s18, %s2541_s9, %s2541_s9, %s2542_s24  }
 0x1d6 PF: > { %p2224_p8 = scmp.ge.s32.totalorder %s2531_s20, 2  ;;  %s1641_s14 = sand.u32 1, %s2511_s15  }
 0x1d7   : > { %p3037_p12 = scmp.ne.s32.totalorder %s3029_s26, 0  ;;  %s1642_s11 = scalar_lea.sflag [#allocation4], %s1641_s14 }
 0x1d9   : > { %p2218_p13 = pnand %p2224_p8, %p3037_p12 }
 0x1db   : > { %p2219_p0 = pneg %p2218_p13 }
 0x1dd   : > { %2506 = dma.done.wait (%p2219_p0), %s1642_s11, 4096  }
 0x1de   : > { %2508 = vsyncadd (%p2219_p0), %s1642_s11, 4294963200  ;;  %s21_s20 = sadd.s32 1, %s2531_s20   ;;  %s3038_s15 = smov %s2515_s16 }
 0x1df   : > { %p18_p2 = scmp.ge.s32.totalorder %s21_s20, 6   ;;  %s3039_s16 = smov %s2519_s17 }
 0x1e0   : > { %s3040_s17 = smov %s2663_s28  ;;  %s3041_s18 = smov %s2527_s19 }
 0x1e1   : > { %s3042_s19 = smov %s3044_s5  ;;  %20 = sbr.rel (!%p18_p2) target bundleno = 9 (0x9), region = 92 }
 0x1e6   :  { %1647 = vsyncpa [#allocation3], 1 }
 0x1e7   :  { %1649 = vsyncpa [#allocation3 + $0x1], 1 }
 0x1e8   :  { %1650 = vsyncpa [#allocation6], 1 }
 0x1e9   :  { %1651 = vsyncpa [#allocation4], 1 }
 0x1ea   :  { %1653 = vsyncpa [#allocation4 + $0x1], 1 }

</bundles_post_ra>
